<compile_context>
chip_gen: v7x
topology: tpu7x:2x2x1
jax: 0.10.0
libtpu: 0.0.40
codegen_flags: <defaults>
</compile_context>

<pallas_src>
import jax
import jax.numpy as jnp
from jax.experimental import pallas as pl
from jax.experimental.pallas import tpu as pltpu

N_HARMONICS = 3
LANE_WIDTH = 1024          # lane-dense last dim (multiple of 128) -> long unmasked stores
SMALL_N_THRESHOLD = 65536  # below this a single fused XLA expression beats a Pallas launch


def _round_up(x, m):
    return -(-x // m) * m


def _default_block_rows():
    """Per-generation streaming block height (rows of 1024 f32 lanes)."""
    try:
        kind = jax.devices()[0].device_kind.lower()
    except Exception:
        return 512
    if "v7" in kind:
        return 1024   # 4 MiB blocks; ~16 MiB double-buffered, fits v7x 32 MiB scoped / 64 MiB VMEM
    return 512        # v5e/v6e: 2 MiB blocks; ~8 MiB double-buffered, under v5e's 16 MiB default


def _pick_tile_rows(rows, block_rows):
    """Tile height; split small/medium inputs into >= 2 blocks so v7x's 2 TCs both work."""
    if rows < 16:
        return rows                                  # full array dim -> satisfies (8,128) rule
    half = _round_up(pl.cdiv(rows, 2), 8)            # >= 2 grid steps when possible
    return min(block_rows, half)


def _fold_params(eigenvalues, params):
    """Hoist all scalar parameter math out of the kernel.

    response = min(base_eff + sum_i coeff_i * exp(-(eig*a_i - c_i)^2), 1.0)
    """
    h = N_HARMONICS
    idx = jnp.arange(h, dtype=jnp.float32)
    fund = jax.nn.sigmoid(params[0]) * 1.5 + 0.1
    base = jax.nn.sigmoid(params[1]) * 0.3
    decay_rate = params[2]
    weight = jax.nn.sigmoid(params[3:3 + h])
    width = jax.nn.sigmoid(params[3 + h:3 + 2 * h]) * 0.3 + 0.05
    harm_freq = fund * (idx + 1.0)
    decay = jnp.exp(-decay_rate * idx * 0.5)
    mask = (harm_freq < 2.0).astype(jnp.float32)     # == PyTorch `if harmonic_freq < 2.0`

    max_eig = jnp.max(eigenvalues) + 1e-08           # global max hoisted to the wrapper
    scale = 2.0 / max_eig                            # folds the `/ max * 2` normalization
    inv_w = 1.0 / width
    a = scale * inv_w                                # (norm - hf)/w == eig*a - c
    c = harm_freq * inv_w
    coeff = weight * decay * mask
    # Lower clip folded into base: every harmonic term is >= 0, so the 1e-6 floor only
    # ever acts through base.  Differs from reference by <= 1e-6 and only when
    # sigmoid(base_level)*0.3 < 1e-6.
    base_eff = jnp.maximum(base, 1e-06)
    return base_eff, a, c, coeff


def _apply_filter_jnp(eig, base_eff, a, c, coeff):
    """Tiny fused elementwise evaluation (small-N fast path and ragged tail)."""
    x = eig[:, None] * a[None, :] - c[None, :]
    resp = base_eff + jnp.sum(coeff[None, :] * jnp.exp(-(x * x)), axis=-1)
    return jnp.minimum(resp, 1.0)


def _harmonic_filter_kernel(params_ref, eig_ref, out_ref):
    # params layout (SMEM, f32[1 + 3*H]) — all scalar math pre-folded in wrapper:
    #   [0]        base_eff = max(sigmoid(base_level) * 0.3, 1e-6)
    #   [1+i]      a_i      = (2 / (max_eig + 1e-8)) / width_i
    #   [1+H+i]    c_i      = harmonic_freq_i / width_i
    #   [1+2H+i]   coeff_i  = weight_i * decay_i * (harmonic_freq_i < 2.0)
    eig = eig_ref[...]                               # (tr, LANE_WIDTH) f32
    acc = jnp.zeros_like(eig)
    for i in range(N_HARMONICS):                     # static unrolled loop
        a = params_ref[1 + i]
        c = params_ref[1 + N_HARMONICS + i]
        coeff = params_ref[1 + 2 * N_HARMONICS + i]
        arg = eig * a - c
        acc = acc + coeff * jnp.exp(-(arg * arg))
    out_ref[...] = jnp.minimum(acc + params_ref[0], 1.0)


def harmonic_spectral_filter(eigenvalues, params, *,
                             small_n_threshold=SMALL_N_THRESHOLD,
                             block_rows=None):
    """eigenvalues: f32[N] (any N >= 0); params: f32[3 + 2*H] raw module parameters."""
    n = eigenvalues.shape[0]
    eig = eigenvalues.astype(jnp.float32)
    params = params.astype(jnp.float32)

    base_eff, a, c, coeff = _fold_params(eig, params)

    # Small-N fast path: one fused XLA elementwise op beats a separate Pallas launch.
    if n < LANE_WIDTH or n < small_n_threshold:
        return _apply_filter_jnp(eig, base_eff, a, c, coeff)

    # ---- Pallas path: lane-dense (rows, 1024) slab, streamed & auto double-buffered.
    n_prefix = (n // LANE_WIDTH) * LANE_WIDTH        # 1024-divisible prefix -> Pallas
    rows = n_prefix // LANE_WIDTH
    if block_rows is None:
        block_rows = _default_block_rows()
    tr = _pick_tile_rows(rows, block_rows)
    grid = (pl.cdiv(rows, tr),)                      # partial last block masked by Pallas

    smem_params = jnp.concatenate([jnp.reshape(base_eff, (1,)), a, c, coeff])
    eig2d = eig[:n_prefix].reshape(rows, LANE_WIDTH)  # identity (no copy) when N % 1024 == 0

    out2d = pl.pallas_call(
        _harmonic_filter_kernel,
        out_shape=jax.ShapeDtypeStruct((rows, LANE_WIDTH), jnp.float32),
        grid=grid,
        in_specs=[
            pl.BlockSpec(memory_space=pltpu.MemorySpace.SMEM),   # tiny scalar coefficient vector
            pl.BlockSpec((tr, LANE_WIDTH), lambda i: (i, 0)),    # streamed eigenvalue tile
        ],
        out_specs=pl.BlockSpec((tr, LANE_WIDTH), lambda i: (i, 0)),
        compiler_params=pltpu.CompilerParams(
            dimension_semantics=("parallel",)),                  # shard tiles across TCs (v7x)
    )(smem_params, eig2d)
    out_prefix = out2d.reshape(n_prefix)

    if n_prefix == n:
        return out_prefix
    # Ragged tail (< 1024 elements): fused jnp expression, single concat.
    tail = _apply_filter_jnp(eig[n_prefix:], base_eff, a, c, coeff)
    return jnp.concatenate([out_prefix, tail])


def _reference(eigenvalues, params):
    """Pure-JAX reference mirroring the PyTorch forward."""
    max_eig = jnp.max(eigenvalues) + 1e-08
    norm = eigenvalues / max_eig * 2.0
    base = jax.nn.sigmoid(params[1]) * 0.3
    response = base * jnp.ones_like(norm)
    fund = jax.nn.sigmoid(params[0]) * 1.5 + 0.1
    decay_rate = params[2]
    for i in range(N_HARMONICS):
        hf = fund * (i + 1)
        w = jax.nn.sigmoid(params[3 + i])
        width = jax.nn.sigmoid(params[3 + N_HARMONICS + i]) * 0.3 + 0.05
        decay = jnp.exp(-decay_rate * (i * 0.5))
        hr = w * decay * jnp.exp(-((norm - hf) / width) ** 2)
        response = response + jnp.where(hf < 2.0, 1.0, 0.0) * hr
    return jnp.clip(response, 1e-06, 1.0)


if __name__ == "__main__":
    key = jax.random.PRNGKey(0)
    k1, k2 = jax.random.split(key)

    # Deterministic parameter initialization (matches nn.Module __init__):
    params = jnp.concatenate([
        jnp.array([0.5, 0.1, 1.0], jnp.float32),          # fundamental_freq, base_level, decay_rate
        jnp.ones((N_HARMONICS,), jnp.float32),            # harmonic_weights
        jnp.ones((N_HARMONICS,), jnp.float32) * 0.1,      # harmonic_widths
    ])

    # Small 1-D eigenvalue spectra (e.g. graph-Laplacian eigenvalues). Ragged lengths
    # exercise the divisible-prefix Pallas path, the masked partial block, and the
    # fused jnp tail.
    n1 = 4 * LANE_WIDTH + 37      # rows=4  -> single small block, grid=(1,)
    n2 = 17 * LANE_WIDTH + 100    # rows=17 -> tr=16, grid=(2,), masked partial last block
    eig1 = jax.random.uniform(k1, (n1,), jnp.float32, 0.0, 3.0)
    eig2 = jax.random.uniform(k2, (n2,), jnp.float32, 0.0, 3.0)

    # Force the Pallas path (small_n_threshold=0) so the kernel itself is exercised.
    pallas_filter = jax.jit(
        lambda e, p: harmonic_spectral_filter(e, p, small_n_threshold=0))

    out1 = jax.block_until_ready(pallas_filter(eig1, params))
    out2 = jax.block_until_ready(pallas_filter(eig2, params))
    ref1 = _reference(eig1, params)
    ref2 = _reference(eig2, params)
    assert out1.shape == eig1.shape and out1.dtype == jnp.float32
    assert out2.shape == eig2.shape and out2.dtype == jnp.float32
    assert jnp.allclose(out1, ref1, rtol=1e-5, atol=1e-5), "mismatch vs reference (n1)"
    assert jnp.allclose(out2, ref2, rtol=1e-5, atol=1e-5), "mismatch vs reference (n2)"

    # Default small-N fast path (single fused XLA op) must agree as well.
    out1_fast = jax.block_until_ready(harmonic_spectral_filter(eig1, params))
    assert jnp.allclose(out1_fast, ref1, rtol=1e-5, atol=1e-5), "mismatch vs reference (fast path)"

    print("KERNEL_OK")
</pallas_src>

<mosaic_0001>
module attributes {stable_mosaic.version = 11 : i64} {
  func.func @_harmonic_filter_kernel(%arg0: i32, %arg1: memref<10xf32, #tpu.memory_space<smem>>, %arg2: memref<4x1024xf32, #tpu.memory_space<vmem>>, %arg3: memref<4x1024xf32, #tpu.memory_space<vmem>>) attributes {dimension_semantics = [#tpu.dimension_semantics<parallel>], iteration_bounds = array<i64: 1>, scalar_prefetch = 0 : i64, scratch_operands = 0 : i64, tpu.core_type = #tpu.core_type<tc>, window_params = [{transform_indices = @transform_0, window_bounds = array<i64: 10>}, {transform_indices = @transform_1, window_bounds = array<i64: 4, 1024>}, {transform_indices = @transform_2, window_bounds = array<i64: 4, 1024>}]} {
    %c0 = arith.constant 0 : index
    %c0_0 = arith.constant 0 : index
    %0 = vector.load %arg2[%c0, %c0_0] : memref<4x1024xf32, #tpu.memory_space<vmem>>, vector<4x1024xf32>
    %cst = arith.constant 0.000000e+00 : f32
    %1 = vector.broadcast %cst : f32 to vector<4x1024xf32>
    %c1 = arith.constant 1 : index
    %2 = memref.load %arg1[%c1] : memref<10xf32, #tpu.memory_space<smem>>
    %c4 = arith.constant 4 : index
    %3 = memref.load %arg1[%c4] : memref<10xf32, #tpu.memory_space<smem>>
    %c7 = arith.constant 7 : index
    %4 = memref.load %arg1[%c7] : memref<10xf32, #tpu.memory_space<smem>>
    %5 = vector.broadcast %2 : f32 to vector<4x1024xf32>
    %6 = arith.mulf %0, %5 : vector<4x1024xf32>
    %7 = vector.broadcast %3 : f32 to vector<4x1024xf32>
    %8 = arith.subf %6, %7 : vector<4x1024xf32>
    %9 = arith.mulf %8, %8 : vector<4x1024xf32>
    %cst_1 = arith.constant 0.000000e+00 : f32
    %10 = vector.broadcast %cst_1 : f32 to vector<4x1024xf32>
    %11 = arith.subf %10, %9 : vector<4x1024xf32>
    %12 = math.exp %11 : vector<4x1024xf32>
    %13 = vector.broadcast %4 : f32 to vector<4x1024xf32>
    %14 = arith.mulf %13, %12 : vector<4x1024xf32>
    %15 = arith.addf %1, %14 : vector<4x1024xf32>
    %c2 = arith.constant 2 : index
    %16 = memref.load %arg1[%c2] : memref<10xf32, #tpu.memory_space<smem>>
    %c5 = arith.constant 5 : index
    %17 = memref.load %arg1[%c5] : memref<10xf32, #tpu.memory_space<smem>>
    %c8 = arith.constant 8 : index
    %18 = memref.load %arg1[%c8] : memref<10xf32, #tpu.memory_space<smem>>
    %19 = vector.broadcast %16 : f32 to vector<4x1024xf32>
    %20 = arith.mulf %0, %19 : vector<4x1024xf32>
    %21 = vector.broadcast %17 : f32 to vector<4x1024xf32>
    %22 = arith.subf %20, %21 : vector<4x1024xf32>
    %23 = arith.mulf %22, %22 : vector<4x1024xf32>
    %cst_2 = arith.constant 0.000000e+00 : f32
    %24 = vector.broadcast %cst_2 : f32 to vector<4x1024xf32>
    %25 = arith.subf %24, %23 : vector<4x1024xf32>
    %26 = math.exp %25 : vector<4x1024xf32>
    %27 = vector.broadcast %18 : f32 to vector<4x1024xf32>
    %28 = arith.mulf %27, %26 : vector<4x1024xf32>
    %29 = arith.addf %15, %28 : vector<4x1024xf32>
    %c3 = arith.constant 3 : index
    %30 = memref.load %arg1[%c3] : memref<10xf32, #tpu.memory_space<smem>>
    %c6 = arith.constant 6 : index
    %31 = memref.load %arg1[%c6] : memref<10xf32, #tpu.memory_space<smem>>
    %c9 = arith.constant 9 : index
    %32 = memref.load %arg1[%c9] : memref<10xf32, #tpu.memory_space<smem>>
    %33 = vector.broadcast %30 : f32 to vector<4x1024xf32>
    %34 = arith.mulf %0, %33 : vector<4x1024xf32>
    %35 = vector.broadcast %31 : f32 to vector<4x1024xf32>
    %36 = arith.subf %34, %35 : vector<4x1024xf32>
    %37 = arith.mulf %36, %36 : vector<4x1024xf32>
    %cst_3 = arith.constant 0.000000e+00 : f32
    %38 = vector.broadcast %cst_3 : f32 to vector<4x1024xf32>
    %39 = arith.subf %38, %37 : vector<4x1024xf32>
    %40 = math.exp %39 : vector<4x1024xf32>
    %41 = vector.broadcast %32 : f32 to vector<4x1024xf32>
    %42 = arith.mulf %41, %40 : vector<4x1024xf32>
    %43 = arith.addf %29, %42 : vector<4x1024xf32>
    %c0_4 = arith.constant 0 : index
    %44 = memref.load %arg1[%c0_4] : memref<10xf32, #tpu.memory_space<smem>>
    %45 = vector.broadcast %44 : f32 to vector<4x1024xf32>
    %46 = arith.addf %43, %45 : vector<4x1024xf32>
    %cst_5 = arith.constant 1.000000e+00 : f32
    %47 = vector.broadcast %cst_5 : f32 to vector<4x1024xf32>
    %48 = arith.minimumf %46, %47 : vector<4x1024xf32>
    %c0_6 = arith.constant 0 : index
    %c0_7 = arith.constant 0 : index
    %49 = vector.load %arg3[%c0_6, %c0_7] : memref<4x1024xf32, #tpu.memory_space<vmem>>, vector<4x1024xf32>
    tpu.vector_store %arg3[%c0_6, %c0_7], %48 {strides = array<i32>} : memref<4x1024xf32, #tpu.memory_space<vmem>>, vector<4x1024xf32>,
    return
  }
  func.func @transform_0(%arg0: i32) -> i32 {
    %c0_i32 = arith.constant 0 : i32
    %c0_i32_0 = arith.constant 0 : i32
    return %c0_i32 : i32
  }
  func.func @transform_1(%arg0: i32) -> (i32, i32) {
    %c0_i32 = arith.constant 0 : i32
    %c0_i32_0 = arith.constant 0 : i32
    return %arg0, %c0_i32 : i32, i32
  }
  func.func @transform_2(%arg0: i32) -> (i32, i32) {
    %c0_i32 = arith.constant 0 : i32
    %c0_i32_0 = arith.constant 0 : i32
    return %arg0, %c0_i32 : i32, i32
  }
}

</mosaic_0001>

<bundles_post_ra>
// kernel: _lambda_.1
= control target key start
LH: loop header
LB: loop body
LE: loop exit
PB: predicated region body
PF: predicated region fallthrough
CT: control target
= control target key end

     0   :  { %7 = vsyncpa [#allocation3], 0  ;;  %s258_s0 = inlined_call_operand.vmem [shape: f32[10], index: 0, kind: input, shape index: {}]   ;;  %s259_s1 = inlined_call_operand.vmem [shape: f32[4,1024], index: 1, kind: input, shape index: {}]   ;;  %s260_s2 = inlined_call_operand.vmem [shape: f32[4,1024], index: 2, kind: output, shape index: {}]  }
   0x1   :  { %s14_s11 = sshll.u32 %s258_s0, 4  ;;  %s15_s11 = int_to_ptr.vmem [resolvable:$true] %s14_s11 }
   0x2   :  { %s195_s12 = scalar_lea.vmem %s15_s11, 16  ;;  %p200_p1 = scmp.lt.s32.totalorder %s15_s11, %s15_s11 }
   0x3   :  { %p196_p0 = scmp.ne.s32.totalorder %s15_s11, %s195_s12  ;;  %p201_p2 = scmp.lt.s32.totalorder %s195_s12, %s195_s12 }
   0x5   :  { %p202_p3 = por %p201_p2, %p200_p1 }
   0x7   :  { %p203_p4 = pnand %p202_p3, %p196_p0 }
   0x9   :  { %206 = shalt.err (!%p203_p4)
}
   0xa   :  { %s209_s13 = smov [#allocation2]  }
   0xb   :  { %17 = dma.vmem_to_smem %s15_s11, 16, %s209_s13, [#allocation3]  }
   0xc   :  { %207 = dma.done.wait [#allocation3], 16  }
   0xd   :  { %208 = vsyncadd [#allocation3], 4294967280 }
   0xe   :  { %23 = sfence }
   0xf   :  { %s161_s14 = sld [smem:[#allocation2 + $0x1]]  ;;  %s162_s15 = sld [smem:[#allocation2 + $0x4]]  ;;  %v24_v0 = vld [vmem:[%s259_s1] sm:$0xff]  ;;  %v25_v1 = vld [vmem:[%s259_s1 + $0x8] sm:$0xff]  ;;  %v26_v14 = vld [vmem:[%s259_s1 + $0x10] sm:$0xff] }
  0x10   :  { %s164_s16 = sld [smem:[#allocation2 + $0x2]]  ;;  %s165_s17 = sld [smem:[#allocation2 + $0x5]]  ;;  %v27_v41 = vld [vmem:[%s259_s1 + $0x18] sm:$0xff] }
  0x11   :  { %s167_s18 = sld [smem:[#allocation2 + $0x3]]  ;;  %s168_s19 = sld [smem:[#allocation2 + $0x6]] }
  0x12   :  { %s240_s27 = sld [smem:[#allocation2 + $0x7]]  ;;  %s242_s28 = sld [smem:[#allocation2 + $0x8]] }
  0x13   :  { %s169_s29 = sld [smem:[#allocation2 + $0x9]]  ;;  %s142_s1 = sld [smem:[#allocation2]] }
  0x15   :  { %v31_v2 = vstv %s161_s14  ;;  %v36_v3 = vstv %s162_s15 }
  0x16   :  { %v32_v4 = vmul.f32 %v31_v2, %v24_v0  ;;  %v69_v5 = vstv %s164_s16  ;;  %v33_v6 = vmul.f32 %v31_v2, %v25_v1  ;;  %v74_v8 = vstv %s165_s17 }
  0x17   :  { %v70_v7 = vmul.f32 %v69_v5, %v24_v0  ;;  %v71_v9 = vmul.f32 %v69_v5, %v25_v1  ;;  %v107_v11 = vstv %s167_s18  ;;  %v112_v12 = vstv %s168_s19 }
  0x18   :  { %v37_v10 = vsub.f32 %v32_v4, %v36_v3  ;;  %v38_v13 = vsub.f32 %v33_v6, %v36_v3  ;;  %v108_v16 = vmul.f32 %v107_v11, %v24_v0  ;;  %v109_v20 = vmul.f32 %v107_v11, %v25_v1 }
  0x19   :  { %v75_v15 = vsub.f32 %v70_v7, %v74_v8  ;;  %v76_v19 = vsub.f32 %v71_v9, %v74_v8  ;;  %v34_v23 = vmul.f32 %v31_v2, %v26_v14  ;;  %v72_v24 = vmul.f32 %v69_v5, %v26_v14 }
  0x1a   :  { %v41_v17 = vmul.f32 %v37_v10, %v37_v10  ;;  %v42_v18 = vmul.f32 %v38_v13, %v38_v13  ;;  %v113_v22 = vsub.f32 %v108_v16, %v112_v12  ;;  %v114_v28 = vsub.f32 %v109_v20, %v112_v12 }
  0x1b   :  { %v79_v21 = vmul.f32 %v75_v15, %v75_v15  ;;  %v80_v27 = vmul.f32 %v76_v19, %v76_v19  ;;  %v39_v31 = vsub.f32 %v34_v23, %v36_v3  ;;  %v77_v32 = vsub.f32 %v72_v24, %v74_v8 }
  0x1c   :  { %v45_v25 = vsub.f32 0.0, %v41_v17  ;;  %v46_v26 = vsub.f32 0.0, %v42_v18  ;;  %v117_v30 = vmul.f32 %v113_v22, %v113_v22  ;;  %v118_v36 = vmul.f32 %v114_v28, %v114_v28 }
  0x1d   :  { %v83_v29 = vsub.f32 0.0, %v79_v21  ;;  %v84_v35 = vsub.f32 0.0, %v80_v27  ;;  %v43_v39 = vmul.f32 %v39_v31, %v39_v31  ;;  %v81_v40 = vmul.f32 %v77_v32, %v77_v32 }
  0x1e   :  { %v49_v33 = vmul.f32 1.442695, %v45_v25  ;;  %v51_v34 = vmul.f32 1.442695, %v46_v26  ;;  %v121_v38 = vsub.f32 0.0, %v117_v30  ;;  %v122_v43 = vsub.f32 0.0, %v118_v36 }
  0x1f   :  { %v87_v37 = vmul.f32 1.442695, %v83_v29  ;;  %v89_v42 = vmul.f32 1.442695, %v84_v35  ;;  %v110_v44 = vmul.f32 %v107_v11, %v26_v14  ;;  %v47_v46 = vsub.f32 0.0, %v43_v39 }
  0x20   :  { %171 = vpow2.f32 %v49_v33  ;;  %v125_v45 = vmul.f32 1.442695, %v121_v38  ;;  %v85_v47 = vsub.f32 0.0, %v81_v40  ;;  %v127_v48 = vmul.f32 1.442695, %v122_v43 }
  0x21   :  { %173 = vpow2.f32 %v87_v37  ;;  %v115_v49 = vsub.f32 %v110_v44, %v112_v12  ;;  %v35_v50 = vmul.f32 %v31_v2, %v27_v41  ;;  %v53_v51 = vmul.f32 1.442695, %v47_v46 }
  0x22   :  { %175 = vpow2.f32 %v51_v34  ;;  %v91_v52 = vmul.f32 1.442695, %v85_v47  ;;  %v73_v53 = vmul.f32 %v69_v5, %v27_v41  ;;  %v111_v56 = vmul.f32 %v107_v11, %v27_v41 }
  0x23   :  { %177 = vpow2.f32 %v125_v45  ;;  %v119_v54 = vmul.f32 %v115_v49, %v115_v49  ;;  %v40_v55 = vsub.f32 %v35_v50, %v36_v3  ;;  %v57_v62 = vstv %s240_s27 }
  0x24   :  { %179 = vpow2.f32 %v89_v42  ;;  %v78_v57 = vsub.f32 %v73_v53, %v74_v8  ;;  %v116_v60 = vsub.f32 %v111_v56, %v112_v12  ;;  %v95_v2 = vstv %s242_s28 }
  0x25   :  { %181 = vpow2.f32 %v127_v48  ;;  %v123_v58 = vsub.f32 0.0, %v119_v54  ;;  %v44_v59 = vmul.f32 %v40_v55, %v40_v55  ;;  %v133_v8 = vstv %s169_s29 }
  0x26   :  { %183 = vpow2.f32 %v53_v51  ;;  %v82_v61 = vmul.f32 %v78_v57, %v78_v57  ;;  %v120_v1 = vmul.f32 %v116_v60, %v116_v60  ;;  %v143_v20 = vstv %s142_s1 }
  0x27   :  { %185 = vpow2.f32 %v91_v52  ;;  %v129_v63 = vmul.f32 1.442695, %v123_v58  ;;  %v48_v0 = vsub.f32 0.0, %v44_v59 }
  0x28   :  { %v86_v4 = vsub.f32 0.0, %v82_v61  ;;  %v124_v3 = vsub.f32 0.0, %v120_v1 }
  0x29   :  { %187 = vpow2.f32 %v129_v63  ;;  %v55_v6 = vmul.f32 1.442695, %v48_v0 }
  0x2a   :  { %v172_v5 = vpop.eup %171  ;;  %v93_v10 = vmul.f32 1.442695, %v86_v4  ;;  %v131_v12 = vmul.f32 1.442695, %v124_v3 }
  0x2b   :  { %v174_v7 = vpop.eup %173  ;;  %v58_v9 = vmul.f32 %v172_v5, %v57_v62  ;;  %189 = vpow2.f32 %v55_v6 }
  0x2c   :  { %v176_v11 = vpop.eup %175  ;;  %v96_v13 = vmul.f32 %v174_v7, %v95_v2  ;;  %191 = vpow2.f32 %v93_v10 }
  0x2d   :  { %v178_v14 = vpop.eup %177  ;;  %v59_v15 = vmul.f32 %v176_v11, %v57_v62  ;;  %193 = vpow2.f32 %v131_v12 }
  0x2e   :  { %v180_v16 = vpop.eup %179  ;;  %v100_v17 = vadd.f32 %v96_v13, %v58_v9  ;;  %v134_v18 = vmul.f32 %v178_v14, %v133_v8 }
  0x2f   :  { %v182_v19 = vpop.eup %181  ;;  %v97_v21 = vmul.f32 %v180_v16, %v95_v2 }
  0x30   :  { %v184_v22 = vpop.eup %183  ;;  %v138_v23 = vadd.f32 %v134_v18, %v100_v17  ;;  %v135_v24 = vmul.f32 %v182_v19, %v133_v8 }
  0x31   :  { %v186_v25 = vpop.eup %185  ;;  %v101_v26 = vadd.f32 %v97_v21, %v59_v15  ;;  %v60_v27 = vmul.f32 %v184_v22, %v57_v62 }
  0x32   :  { %v144_v28 = vadd.f32 %v143_v20, %v138_v23  ;;  %v98_v29 = vmul.f32 %v186_v25, %v95_v2 }
  0x33   :  { %v139_v30 = vadd.f32 %v135_v24, %v101_v26  ;;  %v188_v31 = vpop.eup %187 }
  0x34   :  { %v148_v32 = vmin.f32 %v144_v28, 1.0  ;;  %v102_v33 = vadd.f32 %v98_v29, %v60_v27  ;;  %v136_v35 = vmul.f32 %v188_v31, %v133_v8 }
  0x35   :  { %v145_v34 = vadd.f32 %v143_v20, %v139_v30  ;;  %v190_v36 = vpop.eup %189 }
  0x36   :  { %152 = vst [vmem:[%s260_s2] sm:$0xff] %v148_v32  ;;  %v192_v37 = vpop.eup %191  ;;  %v140_v39 = vadd.f32 %v136_v35, %v102_v33  ;;  %v61_v40 = vmul.f32 %v190_v36, %v57_v62 }
  0x37   :  { %v149_v38 = vmin.f32 %v145_v34, 1.0  ;;  %v194_v41 = vpop.eup %193  ;;  %v99_v42 = vmul.f32 %v192_v37, %v95_v2 }
  0x38   :  { %v146_v43 = vadd.f32 %v143_v20, %v140_v39  ;;  %v137_v44 = vmul.f32 %v194_v41, %v133_v8 }
  0x39   :  { %153 = vst [vmem:[%s260_s2 + $0x8] sm:$0xff] %v149_v38  ;;  %v103_v45 = vadd.f32 %v99_v42, %v61_v40 }
  0x3a   :  { %v150_v46 = vmin.f32 %v146_v43, 1.0 }
  0x3b   :  { %v141_v47 = vadd.f32 %v137_v44, %v103_v45 }
  0x3c   :  { %154 = vst [vmem:[%s260_s2 + $0x10] sm:$0xff] %v150_v46 }
  0x3d   :  { %v147_v48 = vadd.f32 %v143_v20, %v141_v47 }
  0x3f   :  { %v151_v49 = vmin.f32 %v147_v48, 1.0 }
  0x41   :  { %155 = vst [vmem:[%s260_s2 + $0x18] sm:$0xff] %v151_v49 }
  0x42   :  { %160 = vsyncpa [#allocation3], 1 }

</bundles_post_ra>
